<compile_context>
chip_gen: v5e
topology: v5e:2x2
jax: 0.10.0
libtpu: 0.0.40
codegen_flags: <defaults>
</compile_context>

<pallas_src>
import functools

import jax
import jax.numpy as jnp
from jax import lax
from jax.experimental import pallas as pl
from jax.experimental.pallas import tpu as pltpu


_INV_SQRT2 = 0.7071067811865476  # 1 / sqrt(2), hoisted


def _round_up(x, m):
    return (x + m - 1) // m * m


def _gelu(h, approximate):
    if approximate:
        # tanh approximation routes the transcendental to the EUP slot
        # (nearly free next to MXU/VALU) but deviates slightly from torch's
        # exact-erf nn.GELU default -> opt-in only.
        return jax.nn.gelu(h, approximate=True)
    return 0.5 * h * (1.0 + lax.erf(h * _INV_SQRT2))


# ---------------------------------------------------------------------------
# Kernels
# ---------------------------------------------------------------------------

def _mlp_resident_kernel(x_ref, w1_ref, b1_ref, w2_ref, b2_ref, o_ref, *,
                         approximate):
    # x_ref : (TM, C_in_p)    row tile (compute dtype, bf16)
    # w1_ref: (C_in_p, H_p)   full fc1 weight (VMEM-resident, constant index)
    # b1_ref: (1, H_p)        fc1 bias (f32)
    # w2_ref: (H_p, C_out_p)  full fc2 weight (VMEM-resident)
    # b2_ref: (1, C_out_p)    fc2 bias (f32)
    # o_ref : (TM, C_out_p)   output tile
    h = jnp.dot(x_ref[...], w1_ref[...], preferred_element_type=jnp.float32)
    h = h + b1_ref[...]
    g = _gelu(h, approximate)
    y = jnp.dot(g.astype(w2_ref.dtype), w2_ref[...],
                preferred_element_type=jnp.float32)
    # Dropout with p=0.0 is identity -> no-op.
    o_ref[...] = (y + b2_ref[...]).astype(o_ref.dtype)


def _mlp_streamed_kernel(x_ref, w1_ref, b1_ref, w2_ref, b2_ref, o_ref,
                         acc_ref, *, approximate):
    # Hidden dim streamed on grid axis 1; acc_ref is the (TM, C_out_p) f32
    # accumulator held in VMEM across the H axis.
    h_idx = pl.program_id(1)

    h = jnp.dot(x_ref[...], w1_ref[...], preferred_element_type=jnp.float32)
    h = h + b1_ref[...]
    g = _gelu(h, approximate)
    part = jnp.dot(g.astype(w2_ref.dtype), w2_ref[...],
                   preferred_element_type=jnp.float32)

    # First H step writes (saves the zero-fill store + reload of zeros).
    @pl.when(h_idx == 0)
    def _():
        acc_ref[...] = part

    @pl.when(h_idx != 0)
    def _():
        acc_ref[...] += part

    @pl.when(h_idx == pl.num_programs(1) - 1)
    def _():
        o_ref[...] = (acc_ref[...] + b2_ref[...]).astype(o_ref.dtype)


# ---------------------------------------------------------------------------
# Planning helpers
# ---------------------------------------------------------------------------

def _pick_row_tile(M, tm_cap):
    """Largest power-of-two row tile <= tm_cap with small padding waste and,
    when possible, >= 2 row tiles (megacore sharding on v7x)."""
    tm_cap = max(16, tm_cap)
    M16 = _round_up(max(M, 1), 16)
    best = 16
    c = 16
    while c <= tm_cap:
        waste = _round_up(M16, c) - M16
        if waste <= M16 // 8:          # at most ~12.5% padded rows
            best = c
        c *= 2
    while best > 16 and _round_up(M16, best) // best < 2:
        best //= 2
    return best


def _plan(C_in, H, C_out, cbytes, obytes, tile_m, tile_h, budget_bytes):
    """Choose resident-weights vs streamed-H mode and the padded tile sizes."""
    C_in_p = _round_up(C_in, 128)
    C_out_p = _round_up(C_out, 128)
    H_128 = _round_up(H, 128)
    tm_cap = max(16, _round_up(tile_m, 16))

    def resident_bytes(tm):
        return (2 * tm * C_in_p * cbytes              # x (double-buffered)
                + 2 * C_in_p * H_128 * cbytes         # w1 (2nd pipeline buffer budgeted)
                + 2 * H_128 * C_out_p * cbytes        # w2
                + 2 * (H_128 + C_out_p) * 4           # biases (f32)
                + 2 * tm * C_out_p * obytes           # out (double-buffered)
                + tm * H_128 * (4 + cbytes))          # GELU intermediate

    if resident_bytes(tm_cap) <= budget_bytes:
        return dict(mode="resident", C_in_p=C_in_p, C_out_p=C_out_p,
                    H_p=H_128, th=H_128, tm_cap=tm_cap,
                    est_bytes=resident_bytes(tm_cap))

    def streamed_bytes(tm, th):
        return (2 * tm * C_in_p * cbytes
                + 2 * C_in_p * th * cbytes
                + 2 * th * C_out_p * cbytes
                + 2 * (th + C_out_p) * 4
                + 2 * tm * C_out_p * obytes
                + tm * C_out_p * 4                    # f32 accumulator scratch
                + tm * th * (4 + cbytes))             # GELU intermediate

    th = min(max(128, _round_up(tile_h, 128)), H_128)
    while th > 128 and streamed_bytes(tm_cap, th) > budget_bytes:
        th = max(128, _round_up(th // 2, 128))
    while tm_cap > 16 and streamed_bytes(tm_cap, th) > budget_bytes:
        tm_cap = max(16, tm_cap // 2)
    H_p = _round_up(H_128, th)
    return dict(mode="streamed", C_in_p=C_in_p, C_out_p=C_out_p,
                H_p=H_p, th=th, tm_cap=tm_cap,
                est_bytes=streamed_bytes(tm_cap, th))


# ---------------------------------------------------------------------------
# Public API
# ---------------------------------------------------------------------------

def make_mlp(w1, b1, w2, b2, *, tile_m=256, tile_h=1024,
             compute_dtype=jnp.bfloat16, approximate_gelu=False,
             vmem_budget_bytes=40 * 1024 * 1024):
    """Prepare (pad + bf16-cast) the MLP parameters once and return a jitted
    apply(x): fc1 -> GELU -> fc2 (dropout p=0.0 is identity)."""
    C_in, H = w1.shape
    H2, C_out = w2.shape
    assert H2 == H and b1.shape == (H,) and b2.shape == (C_out,)

    cbytes = jnp.dtype(compute_dtype).itemsize
    # obytes budgeted at 4 (worst case f32 activations/outputs).
    plan = _plan(C_in, H, C_out, cbytes, 4, tile_m, tile_h, vmem_budget_bytes)
    C_in_p, H_p, C_out_p = plan["C_in_p"], plan["H_p"], plan["C_out_p"]
    th, tm_cap = plan["th"], plan["tm_cap"]

    # Hoisted parameter prep (done once, not per forward call).
    w1_p = jnp.pad(w1, ((0, C_in_p - C_in), (0, H_p - H))).astype(compute_dtype)
    w2_p = jnp.pad(w2, ((0, H_p - H), (0, C_out_p - C_out))).astype(compute_dtype)
    b1_p = jnp.pad(b1, (0, H_p - H)).astype(jnp.float32).reshape(1, H_p)
    b2_p = jnp.pad(b2, (0, C_out_p - C_out)).astype(jnp.float32).reshape(1, C_out_p)

    # Scoped VMEM limit derived from the actual working set, capped so the
    # tiling stays valid on v7x's 64 MiB physical VMEM.
    vmem_limit = min(48 * 1024 * 1024, int(plan["est_bytes"]) + 4 * 1024 * 1024)

    @jax.jit
    def apply(x):
        assert x.shape[-1] == C_in
        lead = x.shape[:-1]
        M = 1
        for d in lead:
            M *= d
        out_dtype = x.dtype
        obytes = jnp.dtype(out_dtype).itemsize

        tm = _pick_row_tile(M, tm_cap)
        M_p = _round_up(M, tm)
        n_row = M_p // tm

        x2d = x.reshape(M, C_in)
        x2d = jnp.pad(x2d, ((0, M_p - M), (0, C_in_p - C_in))).astype(compute_dtype)

        if plan["mode"] == "resident":
            kernel = functools.partial(_mlp_resident_kernel,
                                       approximate=approximate_gelu)
            grid = (n_row,)
            in_specs = [
                pl.BlockSpec((tm, C_in_p), lambda i: (i, 0)),
                pl.BlockSpec((C_in_p, H_p), lambda i: (0, 0)),   # resident
                pl.BlockSpec((1, H_p), lambda i: (0, 0)),        # resident
                pl.BlockSpec((H_p, C_out_p), lambda i: (0, 0)),  # resident
                pl.BlockSpec((1, C_out_p), lambda i: (0, 0)),    # resident
            ]
            out_specs = pl.BlockSpec((tm, C_out_p), lambda i: (i, 0))
            scratch_shapes = []
            dim_sem = ("parallel",)
            weight_reads = 1            # constant index map -> fetched once
        else:
            kernel = functools.partial(_mlp_streamed_kernel,
                                       approximate=approximate_gelu)
            n_h = H_p // th
            grid = (n_row, n_h)
            in_specs = [
                pl.BlockSpec((tm, C_in_p), lambda i, h: (i, 0)),
                pl.BlockSpec((C_in_p, th), lambda i, h: (0, h)),
                pl.BlockSpec((1, th), lambda i, h: (0, h)),
                pl.BlockSpec((th, C_out_p), lambda i, h: (h, 0)),
                pl.BlockSpec((1, C_out_p), lambda i, h: (0, 0)),
            ]
            out_specs = pl.BlockSpec((tm, C_out_p), lambda i, h: (i, 0))
            scratch_shapes = [pltpu.VMEM((tm, C_out_p), jnp.float32)]
            dim_sem = ("parallel", "arbitrary")
            weight_reads = n_row        # weights re-streamed once per row tile

        cost = pl.CostEstimate(
            flops=2 * M_p * (C_in_p * H_p + H_p * C_out_p),
            transcendentals=M_p * H_p,
            bytes_accessed=(
                M_p * C_in_p * cbytes
                + weight_reads * (C_in_p * H_p + H_p * C_out_p) * cbytes
                + (H_p + C_out_p) * 4
                + M_p * C_out_p * obytes),
        )

        out2d = pl.pallas_call(
            kernel,
            out_shape=jax.ShapeDtypeStruct((M_p, C_out_p), out_dtype),
            grid_spec=pltpu.PrefetchScalarGridSpec(
                num_scalar_prefetch=0,
                grid=grid,
                in_specs=in_specs,
                out_specs=out_specs,
                scratch_shapes=scratch_shapes,
            ),
            compiler_params=pltpu.CompilerParams(
                dimension_semantics=dim_sem,
                vmem_limit_bytes=vmem_limit),
            cost_estimate=cost,
        )(x2d, w1_p, b1_p, w2_p, b2_p)

        return out2d[:M, :C_out].reshape(*lead, C_out)

    return apply


def mlp_pallas(x, w1, b1, w2, b2, **kwargs):
    """One-shot convenience wrapper.  Prefer make_mlp() so the parameter
    pad/cast is hoisted out of the per-call path."""
    return make_mlp(w1, b1, w2, b2, **kwargs)(x)


def mlp_reference(x, w1, b1, w2, b2):
    h = jnp.einsum("...c,ch->...h", x, w1) + b1
    g = 0.5 * h * (1.0 + lax.erf(h * _INV_SQRT2))
    return jnp.einsum("...h,ho->...o", g, w2) + b2


if __name__ == "__main__":
    # Small shapes consistent with the module: tokens of dim in_features.
    B, N = 2, 8
    in_features, hidden_features, out_features = 16, 32, 16

    key = jax.random.PRNGKey(0)
    kx, k1, k2, k3, k4 = jax.random.split(key, 5)

    x = jax.random.normal(kx, (B, N, in_features), dtype=jnp.float32)
    # Deterministic synthetic parameters (shapes as in nn.Linear).
    w1 = jax.random.normal(k1, (in_features, hidden_features), jnp.float32) * 0.05
    b1 = jax.random.normal(k2, (hidden_features,), jnp.float32) * 0.05
    w2 = jax.random.normal(k3, (hidden_features, out_features), jnp.float32) * 0.05
    b2 = jax.random.normal(k4, (out_features,), jnp.float32) * 0.05

    # Resident-weights path (the common case): params prepared once here.
    mlp = make_mlp(w1, b1, w2, b2)
    out = jax.block_until_ready(mlp(x))

    ref = mlp_reference(x, w1, b1, w2, b2)
    assert out.shape == (B, N, out_features)
    # bf16 MXU operands -> tolerance loosened vs the f32 reference.
    assert jnp.allclose(out, ref, atol=1e-2, rtol=1e-2), "resident mismatch"

    # Also exercise the streamed-H fallback path (forced via a tiny budget,
    # hidden dim spanning 2 H tiles of 128).
    hf2 = 256
    w1b = jax.random.normal(k1, (in_features, hf2), jnp.float32) * 0.05
    b1b = jax.random.normal(k2, (hf2,), jnp.float32) * 0.05
    w2b = jax.random.normal(k3, (hf2, out_features), jnp.float32) * 0.05
    mlp_streamed = make_mlp(w1b, b1b, w2b, b2, tile_h=128, vmem_budget_bytes=1)
    out_s = jax.block_until_ready(mlp_streamed(x))
    ref_s = mlp_reference(x, w1b, b1b, w2b, b2)
    assert jnp.allclose(out_s, ref_s, atol=1e-2, rtol=1e-2), "streamed mismatch"

    print("KERNEL_OK")
</pallas_src>

<mosaic_0001>
module attributes {stable_mosaic.version = 11 : i64} {
  func.func @_mlp_resident_kernel(%arg0: i32, %arg1: memref<16x128xbf16, #tpu.memory_space<vmem>>, %arg2: memref<128x128xbf16, #tpu.memory_space<vmem>>, %arg3: memref<1x128xf32, #tpu.memory_space<vmem>>, %arg4: memref<128x128xbf16, #tpu.memory_space<vmem>>, %arg5: memref<1x128xf32, #tpu.memory_space<vmem>>, %arg6: memref<16x128xf32, #tpu.memory_space<vmem>>) attributes {dimension_semantics = [#tpu.dimension_semantics<parallel>], iteration_bounds = array<i64: 1>, scalar_prefetch = 0 : i64, scratch_operands = 0 : i64, tpu.core_type = #tpu.core_type<tc>, window_params = [{transform_indices = @transform_0, window_bounds = array<i64: 16, 128>}, {pipeline_mode = #tpu.pipeline_mode<synchronous>, transform_indices = @transform_1, window_bounds = array<i64: 128, 128>}, {pipeline_mode = #tpu.pipeline_mode<synchronous>, transform_indices = @transform_2, window_bounds = array<i64: 1, 128>}, {pipeline_mode = #tpu.pipeline_mode<synchronous>, transform_indices = @transform_3, window_bounds = array<i64: 128, 128>}, {pipeline_mode = #tpu.pipeline_mode<synchronous>, transform_indices = @transform_4, window_bounds = array<i64: 1, 128>}, {transform_indices = @transform_5, window_bounds = array<i64: 16, 128>}]} {
    %c0 = arith.constant 0 : index
    %c0_0 = arith.constant 0 : index
    %0 = vector.load %arg1[%c0, %c0_0] : memref<16x128xbf16, #tpu.memory_space<vmem>>, vector<16x128xbf16>
    %c0_1 = arith.constant 0 : index
    %c0_2 = arith.constant 0 : index
    %1 = vector.load %arg2[%c0_1, %c0_2] : memref<128x128xbf16, #tpu.memory_space<vmem>>, vector<128x128xbf16>
    %cst = arith.constant dense<0.000000e+00> : vector<16x128xf32>
    %2 = tpu.matmul %0, %1, %cst {dimension_numbers = #tpu.dot_dimension_numbers<[1], [0], [0], [1], [0, 0, 1, 1], [], []>} : vector<16x128xbf16>, vector<128x128xbf16>, vector<16x128xf32> -> vector<16x128xf32>
    %c0_3 = arith.constant 0 : index
    %c0_4 = arith.constant 0 : index
    %3 = vector.load %arg3[%c0_3, %c0_4] : memref<1x128xf32, #tpu.memory_space<vmem>>, vector<1x128xf32>
    %4 = vector.broadcast %3 : vector<1x128xf32> to vector<16x128xf32>
    %5 = arith.addf %2, %4 : vector<16x128xf32>
    %cst_5 = arith.constant 5.000000e-01 : f32
    %6 = vector.broadcast %cst_5 : f32 to vector<16x128xf32>
    %7 = arith.mulf %6, %5 : vector<16x128xf32>
    %cst_6 = arith.constant 0.707106769 : f32
    %8 = vector.broadcast %cst_6 : f32 to vector<16x128xf32>
    %9 = arith.mulf %5, %8 : vector<16x128xf32>
    %10 = math.erf %9 : vector<16x128xf32>
    %cst_7 = arith.constant 1.000000e+00 : f32
    %11 = vector.broadcast %cst_7 : f32 to vector<16x128xf32>
    %12 = arith.addf %11, %10 : vector<16x128xf32>
    %13 = arith.mulf %7, %12 : vector<16x128xf32>
    %14 = arith.truncf %13 : vector<16x128xf32> to vector<16x128xbf16>
    %c0_8 = arith.constant 0 : index
    %c0_9 = arith.constant 0 : index
    %15 = vector.load %arg4[%c0_8, %c0_9] : memref<128x128xbf16, #tpu.memory_space<vmem>>, vector<128x128xbf16>
    %cst_10 = arith.constant dense<0.000000e+00> : vector<16x128xf32>
    %16 = tpu.matmul %14, %15, %cst_10 {dimension_numbers = #tpu.dot_dimension_numbers<[1], [0], [0], [1], [0, 0, 1, 1], [], []>} : vector<16x128xbf16>, vector<128x128xbf16>, vector<16x128xf32> -> vector<16x128xf32>
    %c0_11 = arith.constant 0 : index
    %c0_12 = arith.constant 0 : index
    %17 = vector.load %arg5[%c0_11, %c0_12] : memref<1x128xf32, #tpu.memory_space<vmem>>, vector<1x128xf32>
    %18 = vector.broadcast %17 : vector<1x128xf32> to vector<16x128xf32>
    %19 = arith.addf %16, %18 : vector<16x128xf32>
    %c0_13 = arith.constant 0 : index
    %c0_14 = arith.constant 0 : index
    %20 = vector.load %arg6[%c0_13, %c0_14] : memref<16x128xf32, #tpu.memory_space<vmem>>, vector<16x128xf32>
    tpu.vector_store %arg6[%c0_13, %c0_14], %19 {strides = array<i32>} : memref<16x128xf32, #tpu.memory_space<vmem>>, vector<16x128xf32>,
    return
  }
  func.func @transform_0(%arg0: i32) -> (i32, i32) {
    %c0_i32 = arith.constant 0 : i32
    %c0_i32_0 = arith.constant 0 : i32
    return %arg0, %c0_i32 : i32, i32
  }
  func.func @transform_1(%arg0: i32) -> (i32, i32) {
    %c0_i32 = arith.constant 0 : i32
    %c0_i32_0 = arith.constant 0 : i32
    %c0_i32_1 = arith.constant 0 : i32
    return %c0_i32, %c0_i32_0 : i32, i32
  }
  func.func @transform_2(%arg0: i32) -> (i32, i32) {
    %c0_i32 = arith.constant 0 : i32
    %c0_i32_0 = arith.constant 0 : i32
    %c0_i32_1 = arith.constant 0 : i32
    return %c0_i32, %c0_i32_0 : i32, i32
  }
  func.func @transform_3(%arg0: i32) -> (i32, i32) {
    %c0_i32 = arith.constant 0 : i32
    %c0_i32_0 = arith.constant 0 : i32
    %c0_i32_1 = arith.constant 0 : i32
    return %c0_i32, %c0_i32_0 : i32, i32
  }
  func.func @transform_4(%arg0: i32) -> (i32, i32) {
    %c0_i32 = arith.constant 0 : i32
    %c0_i32_0 = arith.constant 0 : i32
    %c0_i32_1 = arith.constant 0 : i32
    return %c0_i32, %c0_i32_0 : i32, i32
  }
  func.func @transform_5(%arg0: i32) -> (i32, i32) {
    %c0_i32 = arith.constant 0 : i32
    %c0_i32_0 = arith.constant 0 : i32
    return %arg0, %c0_i32 : i32, i32
  }
}

</mosaic_0001>

<bundles_post_ra>
// kernel: apply.1
= control target key start
LH: loop header
LB: loop body
LE: loop exit
PB: predicated region body
PF: predicated region fallthrough
CT: control target
= control target key end

     0   :  { %10 = vsyncpa [#allocation3], 0  ;;  %s543_s0 = inlined_call_operand.vmem [shape: bf16[16,128], index: 0, kind: input, shape index: {}]   ;;  %s544_s1 = inlined_call_operand.hbm [shape: bf16[128,128], index: 1, kind: input, shape index: {}]   ;;  %s545_s2 = inlined_call_operand.vmem [shape: f32[1,128], index: 2, kind: input, shape index: {}]   ;;  %s546_s3 = inlined_call_operand.hbm [shape: bf16[128,128], index: 3, kind: input, shape index: {}]   ;;  %s547_s4 = inlined_call_operand.vmem [shape: f32[1,128], index: 4, kind: input, shape index: {}]   ;;  %s548_s5 = inlined_call_operand.vmem [shape: f32[16,128], index: 5, kind: output, shape index: {}]  }
   0x1   :  { %s18_s20 = sshll.u32 %s544_s1, 4  ;;  %s19_s20 = int_to_ptr.hbm [resolvable:$true] %s18_s20 }
   0x2   :  { %11 = vsyncpa [#allocation5], 0  ;;  %s470_s21 = smov [#allocation2]   ;;  %s33_s25 = sshll.u32 %s546_s3, 4  ;;  %s34_s25 = int_to_ptr.hbm [resolvable:$true] %s33_s25 }
   0x3   :  { %s20_s22 = sshll.u32 %s470_s21, 4  ;;  %s471_s26 = smov 64   ;;  %s21_s22 = int_to_ptr.vmem [resolvable:$true] %s20_s22 }
   0x4   :  { %s472_s27 = smov 4   ;;  %s473_s28 = smov [#allocation4]  }
   0x5   :  { %26 = dma.hbm_to_vmem [thread:$0]  %s19_s20, 1024, %s21_s22, [#allocation3], %s471_s26, %s471_s26, %s472_s27  }
   0x6   :  { %s35_s29 = sshll.u32 %s473_s28, 4  ;;  %s36_s29 = int_to_ptr.vmem [resolvable:$true] %s35_s29 }
   0x7   :  { %41 = dma.hbm_to_vmem [thread:$0]  %s34_s25, 1024, %s36_s29, [#allocation5], %s471_s26, %s471_s26, %s472_s27  }
   0x8   :  { %466 = dma.done.wait [#allocation3], 1024  }
   0x9   :  { %467 = vsyncadd [#allocation3], 4294966272 }
   0xa   :  { %468 = dma.done.wait [#allocation5], 1024  }
   0xb   :  { %469 = vsyncadd [#allocation5], 4294966272  ;;  %v399_v0 = vld [vmem:[#allocation2 + $0x38] sm:$0xff]  ;;  %v398_v1 = vld [vmem:[#allocation2 + $0x30] sm:$0xff] }
   0xc   :  { %128 = vmatpush.bf16.msra.mxu0 %v399_v0  ;;  %v397_v2 = vld [vmem:[#allocation2 + $0x28] sm:$0xff]  ;;  %v396_v3 = vld [vmem:[#allocation2 + $0x20] sm:$0xff]  ;;  %v395_v4 = vld [vmem:[#allocation2 + $0x18] sm:$0xff] }
   0xd   :  { %v394_v5 = vld [vmem:[#allocation2 + $0x10] sm:$0xff]  ;;  %v393_v6 = vld [vmem:[#allocation2 + $0x8] sm:$0xff]  ;;  %v392_v7 = vld [vmem:[#allocation2] sm:$0xff] }
   0xe   :  { %v391_v8 = vld [vmem:[%s543_s0] sm:$0xff]  ;;  %v407_v10 = vld [vmem:[#allocation4 + $0x38] sm:$0xff]  ;;  %v406_v14 = vld [vmem:[#allocation4 + $0x30] sm:$0xff] }
   0xf   :  { %v412_v9 = vld [vmem:[%s545_s2] ss:$0 sm:$0xff]  ;;  %299 = vmatpush.bf16.msra.mxu1 %v407_v10  ;;  %v405_v16 = vld [vmem:[#allocation4 + $0x28] sm:$0xff]  ;;  %v403_v27 = vld [vmem:[#allocation4 + $0x18] sm:$0xff] }
  0x10   :  { %129 = vmatpush.bf16.msra.mxu0 %v398_v1  ;;  %v404_v21 = vld [vmem:[#allocation4 + $0x20] sm:$0xff]  ;;  %v402_v33 = vld [vmem:[#allocation4 + $0x10] sm:$0xff]  ;;  %v401_v41 = vld [vmem:[#allocation4 + $0x8] sm:$0xff] }
  0x11   :  { %v400_v48 = vld [vmem:[#allocation4] sm:$0xff] }
  0x13   :  { %300 = vmatpush.bf16.msra.mxu1 %v406_v14 }
  0x14   :  { %130 = vmatpush.bf16.msra.mxu0 %v397_v2 }
  0x17   :  { %301 = vmatpush.bf16.msra.mxu1 %v405_v16 }
  0x18   :  { %131 = vmatpush.bf16.msra.mxu0 %v396_v3 }
  0x1b   :  { %302 = vmatpush.bf16.msra.mxu1 %v404_v21 }
  0x1c   :  { %132 = vmatpush.bf16.msra.mxu0 %v395_v4 }
  0x1f   :  { %303 = vmatpush.bf16.msra.mxu1 %v403_v27 }
  0x20   :  { %133 = vmatpush.bf16.msra.mxu0 %v394_v5 }
  0x23   :  { %304 = vmatpush.bf16.msra.mxu1 %v402_v33 }
  0x24   :  { %134 = vmatpush.bf16.msra.mxu0 %v393_v6 }
  0x27   :  { %305 = vmatpush.bf16.msra.mxu1 %v401_v41 }
  0x28   :  { %135 = vmatpush.bf16.msra.mxu0 %v392_v7 }
  0x2b   :  { %136 = vmatmul.bf16.vlgmr.msra.gmra.mxu0 %v391_v8  ;;  %306 = vmatpush.bf16.msra.mxu1 %v400_v48 }
  0xa8   :  { %v137_v11 = vpop.f32.mrf.mxu0 }
  0xa9   :  { %v516_v12 = vadd.f32 %v412_v9, %v137_v11 }
  0xab   :  { %v519_v13 = vmul.f32 0.70710677, %v516_v12 }
  0xad   :  { %v146_v15 = vmul.f32 %v519_v13, %v519_v13 }
  0xaf   :  { %v147_v17 = vmin.f32 %v146_v15, 16.0 }
  0xb0   :  { %v139_v18 = vpop.f32.mrf.mxu0 }
  0xb1   :  { %v148_v19 = vmul.f32 2.1237322e-06, %v147_v17  ;;  %v523_v20 = vadd.f32 %v412_v9, %v139_v18  ;;  %v159_v22 = vmul.f32 3.8918573e-05, %v147_v17 }
  0xb3   :  { %v149_v23 = vadd.f32 0.00028619796, %v148_v19  ;;  %v526_v24 = vmul.f32 0.70710677, %v523_v20  ;;  %v160_v25 = vadd.f32 0.001143296, %v159_v22 }
  0xb5   :  { %v186_v26 = vmul.f32 %v526_v24, %v526_v24  ;;  %v150_v28 = vmul.f32 %v149_v23, %v147_v17  ;;  %v161_v29 = vmul.f32 %v160_v25, %v147_v17 }
  0xb7   :  { %v187_v30 = vmin.f32 %v186_v26, 16.0  ;;  %v162_v31 = vadd.f32 0.014752088, %v161_v29  ;;  %v151_v35 = vadd.f32 0.0036580483, %v150_v28 }
  0xb9   :  { %v188_v32 = vmul.f32 2.1237322e-06, %v187_v30  ;;  %v199_v34 = vmul.f32 3.8918573e-05, %v187_v30  ;;  %v163_v36 = vmul.f32 %v162_v31, %v147_v17  ;;  %v152_v43 = vmul.f32 %v151_v35, %v147_v17 }
  0xba   :  { %v143_v35 = vmul.f32 0.5, %v523_v20 }
  0xbb   :  { %v189_v37 = vadd.f32 0.00028619796, %v188_v32  ;;  %v200_v38 = vadd.f32 0.001143296, %v199_v34  ;;  %v164_v39 = vadd.f32 0.112945676, %v163_v36 }
  0xbc   :  { %v153_v50 = vadd.f32 0.05243302, %v152_v43  ;;  %v142_v34 = vmul.f32 0.5, %v516_v12 }
  0xbd   :  { %v190_v40 = vmul.f32 %v189_v37, %v187_v30  ;;  %v201_v42 = vmul.f32 %v200_v38, %v187_v30  ;;  %v165_v44 = vmul.f32 %v164_v39, %v147_v17 }
  0xbe   :  { %v154_v56 = vmul.f32 %v153_v50, %v147_v17 }
  0xbf   :  { %v191_v45 = vadd.f32 0.0036580483, %v190_v40  ;;  %v202_v46 = vadd.f32 0.014752088, %v201_v42  ;;  %v166_v47 = vadd.f32 0.4994258, %v165_v44 }
  0xc0   :  { %v155_v60 = vadd.f32 0.18741608, %v154_v56 }
  0xc1   :  { %v203_v49 = vmul.f32 %v202_v46, %v187_v30  ;;  %v167_v51 = vmul.f32 %v166_v47, %v147_v17  ;;  %v192_v52 = vmul.f32 %v191_v45, %v187_v30 }
  0xc2   :  { %v156_v1 = vmul.f32 %v155_v60, %v147_v17 }
  0xc3   :  { %v204_v53 = vadd.f32 0.112945676, %v203_v49  ;;  %v168_v54 = vadd.f32 1.0, %v167_v51  ;;  %v193_v57 = vadd.f32 0.05243302, %v192_v52 }
  0xc4   :  { %v157_v7 = vadd.f32 1.1283791, %v156_v1 }
  0xc5   :  { %v205_v55 = vmul.f32 %v204_v53, %v187_v30  ;;  %414 = vrcp.f32 %v168_v54  ;;  %v194_v61 = vmul.f32 %v193_v57, %v187_v30  ;;  %v180_v4 = vand.u32 2147483648, %v168_v54 }
  0xc6   :  { %v178_v6 = vand.u32 2147483647, %v168_v54  ;;  %vm174_vm1 = vweird.f32 %v168_v54  ;;  %v158_v16 = vmul.f32 %v157_v7, %v519_v13 }
  0xc7   :  { %v206_v58 = vadd.f32 0.4994258, %v205_v55  ;;  %v195_v2 = vadd.f32 0.18741608, %v194_v61  ;;  %v181_v11 = vor.u32 1.1754944e-38, %v180_v4 }
  0xc8   :  { %vm179_vm3 = vcmp.eq.f32.partialorder %v178_v6, 8.507059e+37 }
  0xc9   :  { %v207_v59 = vmul.f32 %v206_v58, %v187_v30  ;;  %v196_v9 = vmul.f32 %v195_v2, %v187_v30 }
  0xcb   :  { %v208_v62 = vadd.f32 1.0, %v207_v59  ;;  %v415_v63 = vpop.eup %414  ;;  %v197_v19 = vadd.f32 1.1283791, %v196_v9 }
  0xcc   :  { %v170_v0 = vmul.f32 %v415_v63, %v168_v54  ;;  %vm175_vm0 = vweird.f32 %v415_v63 }
  0xcd   :  { %416 = vrcp.f32 %v208_v62  ;;  %vm176_vm2 = vmor %vm174_vm1, %vm175_vm0  ;;  %v220_v21 = vand.u32 2147483648, %v208_v62  ;;  %v218_v25 = vand.u32 2147483647, %v208_v62  ;;  %vm214_vm5 = vweird.f32 %v208_v62 }
  0xce   :  { %v171_v3 = vsub.f32 1.0, %v170_v0  ;;  %v198_v28 = vmul.f32 %v197_v19, %v526_v24  ;;  %v413_v24 = vld [vmem:[%s547_s4] ss:$0 sm:$0xff] }
  0xcf   :  { %v221_v27 = vor.u32 1.1754944e-38, %v220_v21  ;;  %vm219_vm7 = vcmp.eq.f32.partialorder %v218_v25, 8.507059e+37 }
  0xd0   :  { %v172_v5 = vmul.f32 %v415_v63, %v171_v3 }
  0xd2   :  { %v173_v10 = vadd.f32 %v415_v63, %v172_v5 }
  0xd3   :  { %v417_v8 = vpop.eup %416 }
  0xd4   :  { %v210_v14 = vmul.f32 %v417_v8, %v208_v62  ;;  %v177_v15 = vsel %vm176_vm2, %v415_v63, %v173_v10  ;;  %vm215_vm4 = vweird.f32 %v417_v8 }
  0xd5   :  { %v182_v18 = vsel %vm179_vm3, %v181_v11, %v177_v15  ;;  %vm216_vm6 = vmor %vm214_vm5, %vm215_vm4 }
  0xd6   :  { %v211_v17 = vsub.f32 1.0, %v210_v14  ;;  %v183_v22 = vmul.f32 %v182_v18, %v158_v16 }
  0xd8   :  { %v212_v23 = vmul.f32 %v417_v8, %v211_v17  ;;  %v357_v29 = vclamps-f32 %v183_v22, 1.0 }
  0xda   :  { %v213_v26 = vadd.f32 %v417_v8, %v212_v23  ;;  %v226_v33 = vadd.f32 1.0, %v357_v29 }
  0xdc   :  { %v217_v30 = vsel %vm216_vm6, %v417_v8, %v213_v26  ;;  %v228_v37 = vmul.f32 %v226_v33, %v142_v34 }
  0xdd   :  { %v222_v31 = vsel %vm219_vm7, %v221_v27, %v217_v30 }
  0xde   :  { %v223_v32 = vmul.f32 %v222_v31, %v198_v28 }
  0xe0   :  { %v358_v13 = vclamps-f32 %v223_v32, 1.0 }
  0xe2   :  { %v227_v36 = vadd.f32 1.0, %v358_v13 }
  0xe4   :  { %v229_v38 = vmul.f32 %v227_v36, %v143_v35 }
  0xe6   :  { %v230_v39 = vpack.c.bf16 %v229_v38, %v228_v37 }
  0xe8   :  { %307 = vmatmul.bf16.vlgmr.msra.gmra.mxu1 %v230_v39 }
 0x165   :  { %v308_v40 = vpop.f32.mrf.mxu1 }
 0x166   :  { %v309_v41 = vadd.f32 %v413_v24, %v308_v40 }
 0x168   :  { %313 = vst [vmem:[%s548_s5] sm:$0xff] %v309_v41 }
 0x16d   :  { %v310_v42 = vpop.f32.mrf.mxu1 }
 0x16e   :  { %v311_v43 = vadd.f32 %v413_v24, %v310_v42 }
 0x170   :  { %314 = vst [vmem:[%s548_s5 + $0x8] sm:$0xff] %v311_v43 }
 0x171   :  { %319 = vsyncpa [#allocation3], 1 }
 0x172   :  { %320 = vsyncpa [#allocation5], 1 }

</bundles_post_ra>
